<compile_context>
chip_gen: v7x
topology: tpu7x:2x2x1
jax: 0.10.0
libtpu: 0.0.40
codegen_flags: <defaults>
</compile_context>

<pallas_src>
import jax
import jax.numpy as jnp
from jax.experimental import pallas as pl
from jax.experimental.pallas import tpu as pltpu

_SUBLANE = 8
_TILE_B_MAX = 4096  # double-buffered in/out at this tile is well under v5e's 16 MiB


def _round_up(x, m):
    return (x + m - 1) // m * m


def encoder_kernel(x_ref, w1_ref, b1_ref, w2_ref, b2_ref, out_ref):
    """One batch tile: out = relu(tanh(x @ W1 + b1) @ W2 + b2).

    W2 holds [w21 | w22] along its last dim, so a single MXU push + single
    store covers both heads; the wrapper slices mu / logvar out of the slab.
    """
    x = x_ref[...]                                                # (tb, D_in)
    y = jnp.tanh(
        jnp.dot(x, w1_ref[...], preferred_element_type=jnp.float32,
                precision=jax.lax.Precision.HIGHEST)
        + b1_ref[...])                                            # (tb, H_pad)
    z = jnp.dot(y, w2_ref[...], preferred_element_type=jnp.float32,
                precision=jax.lax.Precision.HIGHEST) \
        + b2_ref[...]                                             # (tb, 2L)
    out_ref[...] = jnp.maximum(z, 0.0)                            # fused ReLU


def prepare_encoder_params(params):
    """Pad H=30 -> 32 (sublane granule) and fuse the two heads into one
    (H_pad, 2*latent) weight slab.  Call ONCE at init; result is reused for
    every encoder_forward call (no per-call weight scatter on the hot path)."""
    w1, b1, w21, b21, w22, b22 = params
    d_in, h = w1.shape
    latent = w21.shape[1]
    h_pad = _round_up(h, _SUBLANE)          # 30 -> 32
    n_out = 2 * latent                      # no lane padding -> no 4x write amp

    w1_p = jnp.zeros((d_in, h_pad), jnp.float32).at[:, :h].set(w1)
    b1_p = jnp.zeros((1, h_pad), jnp.float32).at[:, :h].set(b1)
    w2_p = jnp.zeros((h_pad, n_out), jnp.float32).at[:h, :].set(
        jnp.concatenate([w21, w22], axis=1))
    b2_p = jnp.concatenate([b21, b22], axis=1)
    return (w1_p, b1_p, w2_p, b2_p, latent)


def encoder_forward(x, fused_params, *, tile_b_max=_TILE_B_MAX):
    w1_p, b1_p, w2_p, b2_p, latent = fused_params
    B, d_in = x.shape
    h_pad = w1_p.shape[1]
    n_out = w2_p.shape[1]

    # Balanced batch tiling:
    #  * large tiles (<= tile_b_max rows) to amortize the ~0.35us grid-step cost
    #  * n_tiles >= 2 and even whenever B allows, so v7x's 2 TensorCores both
    #    get work on the "parallel" batch axis
    #  * tile_b = ceil(B/n_tiles) rounded to 8 -> padding never exceeds a few
    #    sublane rows per tile (no full extra tile of wasted work)
    b_sub = _round_up(B, _SUBLANE)
    n_tiles = pl.cdiv(b_sub, tile_b_max)
    if b_sub >= 2 * _SUBLANE:
        n_tiles = max(n_tiles, 2)
        if n_tiles % 2:
            n_tiles += 1
    tile_b = _round_up(pl.cdiv(b_sub, n_tiles), _SUBLANE)
    B_pad = tile_b * n_tiles
    if B_pad != B:
        x = jnp.pad(x, ((0, B_pad - B), (0, 0)))

    cost = pl.CostEstimate(
        flops=2 * B_pad * (d_in * h_pad + h_pad * n_out),
        transcendentals=B_pad * h_pad,
        bytes_accessed=4 * (B_pad * (d_in + n_out)
                            + d_in * h_pad + h_pad * n_out + h_pad + n_out),
    )

    # TODO(synk): for a further ~1.5-2x on v5e/v6e, cast x and the output slab
    # to bf16 at this boundary (keep f32 MXU accumulate) once a relaxed
    # tolerance vs. the f32 reference is acceptable.
    out = pl.pallas_call(
        encoder_kernel,
        grid_spec=pl.GridSpec(
            grid=(n_tiles,),
            in_specs=[
                # x: tiled along batch (last dim == full array dim -> legal).
                pl.BlockSpec((tile_b, d_in), lambda i: (i, 0)),
                # Weights / biases: constant index_map -> VMEM-resident.
                pl.BlockSpec((d_in, h_pad), lambda i: (0, 0)),
                pl.BlockSpec((1, h_pad), lambda i: (0, 0)),
                pl.BlockSpec((h_pad, n_out), lambda i: (0, 0)),
                pl.BlockSpec((1, n_out), lambda i: (0, 0)),
            ],
            # Fused (tile_b, 2*latent) output block; last dim == full array dim
            # so the <128-wide block is legal (masked stores, but ~4x fewer
            # HBM bytes than the previous 128-padded slab for latent_dim=16).
            out_specs=pl.BlockSpec((tile_b, n_out), lambda i: (i, 0)),
        ),
        out_shape=jax.ShapeDtypeStruct((B_pad, n_out), jnp.float32),
        compiler_params=pltpu.CompilerParams(
            dimension_semantics=("parallel",)),
        cost_estimate=cost,
    )(x, w1_p, b1_p, w2_p, b2_p)

    mu = out[:B, :latent]
    logvar = out[:B, latent:]
    return mu, logvar


def init_params(key, input_dim, latent_dim):
    """Deterministic init mimicking torch.nn.Linear default
    (U[-1/sqrt(fan_in), 1/sqrt(fan_in)])."""
    H = 30
    ks = jax.random.split(key, 6)

    def linear(kw, kb, fan_in, fan_out):
        bound = 1.0 / jnp.sqrt(jnp.float32(fan_in))
        w = jax.random.uniform(kw, (fan_in, fan_out), jnp.float32, -bound, bound)
        b = jax.random.uniform(kb, (1, fan_out), jnp.float32, -bound, bound)
        return w, b

    w1, b1 = linear(ks[0], ks[1], input_dim, H)
    w21, b21 = linear(ks[2], ks[3], H, latent_dim)
    w22, b22 = linear(ks[4], ks[5], H, latent_dim)
    return (w1, b1, w21, b21, w22, b22)


def encoder_ref(x, params):
    """Pure-JAX reference of the PyTorch forward, for validation."""
    w1, b1, w21, b21, w22, b22 = params
    y = jnp.tanh(x @ w1 + b1)
    return jax.nn.relu(y @ w21 + b21), jax.nn.relu(y @ w22 + b22)


if __name__ == "__main__":
    input_dim, latent_dim = 32, 16
    B = 16

    key = jax.random.PRNGKey(0)
    kx, kp = jax.random.split(key)
    x = jax.random.normal(kx, (B, input_dim), jnp.float32)
    params = init_params(kp, input_dim, latent_dim)

    fused = prepare_encoder_params(params)   # one-time padding / head fusion
    mu, logvar = encoder_forward(x, fused)
    jax.block_until_ready((mu, logvar))

    mu_ref, lv_ref = encoder_ref(x, params)
    assert mu.shape == (B, latent_dim) and logvar.shape == (B, latent_dim)
    assert jnp.allclose(mu, mu_ref, atol=1e-5, rtol=1e-5)
    assert jnp.allclose(logvar, lv_ref, atol=1e-5, rtol=1e-5)

    # Also exercise a ragged batch to check the padding/tiling path.
    xb = jax.random.normal(kx, (37, input_dim), jnp.float32)
    mu_b, lv_b = encoder_forward(xb, fused)
    jax.block_until_ready((mu_b, lv_b))
    mu_br, lv_br = encoder_ref(xb, params)
    assert jnp.allclose(mu_b, mu_br, atol=1e-5, rtol=1e-5)
    assert jnp.allclose(lv_b, lv_br, atol=1e-5, rtol=1e-5)

    print("KERNEL_OK")
</pallas_src>

<mosaic_0001>
module attributes {stable_mosaic.version = 11 : i64} {
  func.func @encoder_kernel(%arg0: i32, %arg1: memref<8x32xf32, #tpu.memory_space<vmem>>, %arg2: memref<32x32xf32, #tpu.memory_space<vmem>>, %arg3: memref<1x32xf32, #tpu.memory_space<vmem>>, %arg4: memref<32x32xf32, #tpu.memory_space<vmem>>, %arg5: memref<1x32xf32, #tpu.memory_space<vmem>>, %arg6: memref<8x32xf32, #tpu.memory_space<vmem>>) attributes {dimension_semantics = [#tpu.dimension_semantics<parallel>], iteration_bounds = array<i64: 2>, scalar_prefetch = 0 : i64, scratch_operands = 0 : i64, tpu.core_type = #tpu.core_type<tc>, window_params = [{transform_indices = @transform_0, window_bounds = array<i64: 8, 32>}, {pipeline_mode = #tpu.pipeline_mode<synchronous>, transform_indices = @transform_1, window_bounds = array<i64: 32, 32>}, {pipeline_mode = #tpu.pipeline_mode<synchronous>, transform_indices = @transform_2, window_bounds = array<i64: 1, 32>}, {pipeline_mode = #tpu.pipeline_mode<synchronous>, transform_indices = @transform_3, window_bounds = array<i64: 32, 32>}, {pipeline_mode = #tpu.pipeline_mode<synchronous>, transform_indices = @transform_4, window_bounds = array<i64: 1, 32>}, {transform_indices = @transform_5, window_bounds = array<i64: 8, 32>}]} {
    %c0 = arith.constant 0 : index
    %c0_0 = arith.constant 0 : index
    %0 = vector.load %arg1[%c0, %c0_0] : memref<8x32xf32, #tpu.memory_space<vmem>>, vector<8x32xf32>
    %c0_1 = arith.constant 0 : index
    %c0_2 = arith.constant 0 : index
    %1 = vector.load %arg2[%c0_1, %c0_2] : memref<32x32xf32, #tpu.memory_space<vmem>>, vector<32x32xf32>
    %cst = arith.constant dense<0.000000e+00> : vector<8x32xf32>
    %2 = tpu.matmul %0, %1, %cst {dimension_numbers = #tpu.dot_dimension_numbers<[1], [0], [0], [1], [0, 0, 1, 1], [], []>, precision = #tpu.contract_precision<fp32>} : vector<8x32xf32>, vector<32x32xf32>, vector<8x32xf32> -> vector<8x32xf32>
    %c0_3 = arith.constant 0 : index
    %c0_4 = arith.constant 0 : index
    %3 = vector.load %arg3[%c0_3, %c0_4] : memref<1x32xf32, #tpu.memory_space<vmem>>, vector<1x32xf32>
    %4 = vector.broadcast %3 : vector<1x32xf32> to vector<8x32xf32>
    %5 = arith.addf %2, %4 : vector<8x32xf32>
    %6 = math.tanh %5 : vector<8x32xf32>
    %c0_5 = arith.constant 0 : index
    %c0_6 = arith.constant 0 : index
    %7 = vector.load %arg4[%c0_5, %c0_6] : memref<32x32xf32, #tpu.memory_space<vmem>>, vector<32x32xf32>
    %cst_7 = arith.constant dense<0.000000e+00> : vector<8x32xf32>
    %8 = tpu.matmul %6, %7, %cst_7 {dimension_numbers = #tpu.dot_dimension_numbers<[1], [0], [0], [1], [0, 0, 1, 1], [], []>, precision = #tpu.contract_precision<fp32>} : vector<8x32xf32>, vector<32x32xf32>, vector<8x32xf32> -> vector<8x32xf32>
    %c0_8 = arith.constant 0 : index
    %c0_9 = arith.constant 0 : index
    %9 = vector.load %arg5[%c0_8, %c0_9] : memref<1x32xf32, #tpu.memory_space<vmem>>, vector<1x32xf32>
    %10 = vector.broadcast %9 : vector<1x32xf32> to vector<8x32xf32>
    %11 = arith.addf %8, %10 : vector<8x32xf32>
    %cst_10 = arith.constant 0.000000e+00 : f32
    %12 = vector.broadcast %cst_10 : f32 to vector<8x32xf32>
    %13 = arith.maximumf %11, %12 : vector<8x32xf32>
    %c0_11 = arith.constant 0 : index
    %c0_12 = arith.constant 0 : index
    %14 = vector.load %arg6[%c0_11, %c0_12] : memref<8x32xf32, #tpu.memory_space<vmem>>, vector<8x32xf32>
    tpu.vector_store %arg6[%c0_11, %c0_12], %13 {strides = array<i32>} : memref<8x32xf32, #tpu.memory_space<vmem>>, vector<8x32xf32>,
    return
  }
  func.func @transform_0(%arg0: i32) -> (i32, i32) {
    %c0_i32 = arith.constant 0 : i32
    %c0_i32_0 = arith.constant 0 : i32
    return %arg0, %c0_i32 : i32, i32
  }
  func.func @transform_1(%arg0: i32) -> (i32, i32) {
    %c0_i32 = arith.constant 0 : i32
    %c0_i32_0 = arith.constant 0 : i32
    %c0_i32_1 = arith.constant 0 : i32
    return %c0_i32, %c0_i32_0 : i32, i32
  }
  func.func @transform_2(%arg0: i32) -> (i32, i32) {
    %c0_i32 = arith.constant 0 : i32
    %c0_i32_0 = arith.constant 0 : i32
    %c0_i32_1 = arith.constant 0 : i32
    return %c0_i32, %c0_i32_0 : i32, i32
  }
  func.func @transform_3(%arg0: i32) -> (i32, i32) {
    %c0_i32 = arith.constant 0 : i32
    %c0_i32_0 = arith.constant 0 : i32
    %c0_i32_1 = arith.constant 0 : i32
    return %c0_i32, %c0_i32_0 : i32, i32
  }
  func.func @transform_4(%arg0: i32) -> (i32, i32) {
    %c0_i32 = arith.constant 0 : i32
    %c0_i32_0 = arith.constant 0 : i32
    %c0_i32_1 = arith.constant 0 : i32
    return %c0_i32, %c0_i32_0 : i32, i32
  }
  func.func @transform_5(%arg0: i32) -> (i32, i32) {
    %c0_i32 = arith.constant 0 : i32
    %c0_i32_0 = arith.constant 0 : i32
    return %arg0, %c0_i32 : i32, i32
  }
}

</mosaic_0001>

<bundles_post_ra>
// kernel: tpu_custom_call.1
= control target key start
LH: loop header
LB: loop body
LE: loop exit
PB: predicated region body
PF: predicated region fallthrough
CT: control target
= control target key end

     0   :  { %10 = vsyncpa [#allocation3], 0  ;;  %s2245_s0 = inlined_call_operand.hbm [shape: f32[16,32], index: 0, kind: input, shape index: {}]   ;;  %s2246_s1 = inlined_call_operand.hbm [shape: f32[32,32], index: 1, kind: input, shape index: {}]   ;;  %s2247_s2 = inlined_call_operand.vmem [shape: f32[1,32], index: 2, kind: input, shape index: {}]   ;;  %s2248_s3 = inlined_call_operand.hbm [shape: f32[32,32], index: 3, kind: input, shape index: {}]   ;;  %s2249_s4 = inlined_call_operand.vmem [shape: f32[1,32], index: 4, kind: input, shape index: {}]   ;;  %s2250_s5 = inlined_call_operand.hbm [shape: f32[16,32], index: 5, kind: output, shape index: {}]  }
   0x1   :  { %12 = vsyncpa [#allocation3 + $0x1], 0 }
   0x2   :  { %13 = vsyncpa [#allocation6], 0 }
   0x3   :  { %14 = vsyncpa [#allocation4], 0 }
   0x4   :  { %16 = vsyncpa [#allocation4 + $0x1], 0  ;;  %s1950_s18 = smov 0   ;;  %s1952_s19 = smov 0  }
   0x5   :  { %s1954_s20 = smov 0   ;;  %s1956_s21 = smov 0  }
   0x6 LB: > { %s1971_s22 = sadd.s32 4294967295, %s1909_s21   ;;  %s1375_s23 = sadd.s32 4294967294, %s1909_s21   ;;  %s1909_s21 = sphi %s1956_s21, %s2270_s21   ;;  %s1905_s20 = sphi %s1954_s20, %s2269_s20   ;;  %s1901_s19 = sphi %s1952_s19, %s2268_s19   ;;  %s1897_s18 = sphi %s1950_s18, %s2267_s18  }
   0x7   : > { %p42_p0 = scmp.ne.s32.totalorder %s1901_s19, %s1897_s18  ;;  %p2251_p1 = scmp.eq.s32.totalorder %s1971_s22, 0 }
   0x8   : > { %p156_p3 = scmp.eq.s32.totalorder %s1375_s23, 1  ;;  %p1376_p5 = scmp.ge.s32.totalorder %s1909_s21, 1 }
   0x9   : > { %p1980_p4 = por %p2251_p1, %p42_p0  ;;  %p163_p7 = scmp.lt.s32.totalorder %s1909_s21, 3 }
   0xa   : > { %p1985_p6 = por %p156_p3, %p42_p0  ;;  %s1911_s27 = smov [#allocation5]  }
   0xb   : > { %s2254_s24 = scalar_select %p1980_p4, 1, 0 }
   0xc   : > { %s2255_s25 = scalar_select %p1985_p6, 1, 0 }
   0xd   : > { %p1990_p8 = pnand %p1376_p5, %p163_p7  ;;  %s175_s28 = sshll.u32 %s1911_s27, 4  ;;  %s1994_s28 = int_to_ptr.vmem [resolvable:$true] %s175_s28 }
   0xe   : > { %s1912_s30 = smov [#allocation7]   ;;  %s1753_s9 = scalar_lea.hbm %s2246_s1, 512 }
   0xf   : > { %p1691_p9 = pneg %p1990_p8  ;;  %s191_s6 = sshll.u32 %s1912_s30, 4  ;;  %s2005_s6 = int_to_ptr.vmem [resolvable:$true] %s191_s6 }
  0x10   : > { %p1754_p12 = scmp.ne.s32.totalorder %s2246_s1, %s1753_s9  ;;  %p1760_p5 = scmp.lt.u32.totalorder %s1753_s9, %s2246_s1 }
  0x11   : > { %p2001_p11 = pnand %p1691_p9, %p2251_p1 }
  0x13   : > { %p1755_p13 = pneg %p2001_p11 }
  0x15   : > { %p1756_p0 = pnand %p1755_p13, %p1754_p12 }
  0x17   : > { %p1757_p3 = pneg %p1756_p0 }
  0x19   : > { %p1762_p7 = pnand %p1760_p5, %p1757_p3 }
  0x1b   : > { %1765 = shalt.err (!%p1762_p7)
}
  0x1c   : > { %s1766_s14 = scalar_lea.vmem %s1994_s28, 512  ;;  %p1774_p2 = scmp.lt.s32.totalorder %s1994_s28, %s1994_s28 }
  0x1d   : > { %p1767_p9 = scmp.ne.s32.totalorder %s1994_s28, %s1766_s14  ;;  %p1775_p12 = scmp.lt.s32.totalorder %s1766_s14, %s1766_s14 }
  0x1f   : > { %p1769_p10 = pnand %p1767_p9, %p1755_p13  ;;  %p1776_p0 = por %p1775_p12, %p1774_p2 }
  0x21   : > { %p1770_p1 = pneg %p1769_p10 }
  0x23   : > { %p1777_p6 = pnand %p1776_p0, %p1770_p1 }
  0x25   : > { %1780 = shalt.err (!%p1777_p6)
}
  0x26   : > { %s1913_s15 = smov 128   ;;  %s1914_s16 = smov 8  }
  0x27   : > { %1694 = dma.hbm_to_vmem [thread:$0]  (!%p2001_p11), %s2246_s1, 512, %s1994_s28, [#allocation6], %s1913_s15, %s1913_s15, %s1914_s16  }
  0x28   : > { %s1781_s7 = scalar_lea.hbm %s2248_s3, 512 }
  0x29   : > { %p1782_p2 = scmp.ne.s32.totalorder %s2248_s3, %s1781_s7  ;;  %p1788_p10 = scmp.lt.u32.totalorder %s1781_s7, %s2248_s3 }
  0x2b   : > { %p1784_p1 = pnand %p1782_p2, %p1755_p13 }
  0x2d   : > { %p1785_p6 = pneg %p1784_p1 }
  0x2f   : > { %p1790_p3 = pnand %p1788_p10, %p1785_p6 }
  0x31   : > { %1793 = shalt.err (!%p1790_p3)
}
  0x32   : > { %s1794_s28 = scalar_lea.vmem %s2005_s6, 512  ;;  %p1802_p12 = scmp.lt.s32.totalorder %s2005_s6, %s2005_s6 }
  0x33   : > { %p1795_p5 = scmp.ne.s32.totalorder %s2005_s6, %s1794_s28  ;;  %p1803_p0 = scmp.lt.s32.totalorder %s1794_s28, %s1794_s28 }
  0x35   : > { %p1797_p7 = pnand %p1795_p5, %p1755_p13  ;;  %p1804_p2 = por %p1803_p0, %p1802_p12 }
  0x37   : > { %p1798_p9 = pneg %p1797_p7 }
  0x39   : > { %p1805_p1 = pnand %p1804_p2, %p1798_p9 }
  0x3b   : > { %1808 = shalt.err (!%p1805_p1)
}
  0x3c   : > { %1697 = dma.hbm_to_vmem [thread:$0]  (!%p2001_p11), %s2248_s3, 512, %s2005_s6, [#allocation6], %s1913_s15, %s1913_s15, %s1914_s16  }
  0x3d   : > { %s2060_s14 = sadd.s32 1, %s1909_s21   ;;  %s29_s29 = sadd.s32 1, %s1905_s20 }
  0x3e   : > { %s26_s17 = ssub.s32 %s1909_s21, %s2060_s14  ;;  %p36_p13 = scmp.ne.s32.totalorder %s1905_s20, %s1901_s19 }
  0x3f   : > { %p27_p6 = scmp.eq.s32.totalorder %s26_s17, 0  ;;  %p37_p10 = scmp.eq.s32.totalorder %s1909_s21, 0 }
  0x40   : > { %p2258_p3 = scmp.eq.s32.totalorder %s1971_s22, 1  ;;  %p1708_p7 = scmp.lt.s32.totalorder %s1909_s21, 2 }
  0x41   : > { %s2076_s27 = scalar_select %p27_p6, %s1905_s20, %s29_s29  }
  0x42   : > { %p2070_p5 = por %p2258_p3, %p36_p13  ;;  %p38_p9 = por %p37_p10, %p36_p13 }
  0x43   : > { %s208_s30 = sand.u32 1, %s1905_s20   ;;  %s1381_s6 = sshll.u32 %s1909_s21, 7 }
  0x44   : > { %s2259_s23 = scalar_select %p2070_p5, 1, 0 }
  0x45   : > { %s1380_s7 = sshll.u32 %s208_s30, 3  ;;  %s2083_s8 = scalar_lea.hbm %s2245_s0, %s1381_s6 }
  0x46   : > { %s212_s9 = scalar_lea.vmem [#allocation2], %s1380_s7  ;;  %p2087_p11 = pnand %p1708_p7, %p38_p9 }
  0x47   : > { %s219_s10 = sshll.u32 %s212_s9, 4  ;;  %s209_s28 = scalar_lea.sflag [#allocation3], %s208_s30  ;;  %s2085_s10 = int_to_ptr.vmem [resolvable:$true] %s219_s10 }
  0x48   : > { %s1809_s12 = scalar_lea.hbm %s2083_s8, 128  ;;  %p1811_p0 = pneg %p2087_p11 }
  0x49   : > { %p1810_p12 = scmp.ne.s32.totalorder %s2083_s8, %s1809_s12  ;;  %s1814_s17 = scalar_lea.hbm %s2245_s0, 256 }
  0x4a   : > { %p1815_p13 = scmp.lt.u32.totalorder %s2083_s8, %s2245_s0  ;;  %p1816_p6 = scmp.lt.u32.totalorder %s1814_s17, %s1809_s12 }
  0x4b   : > { %p1812_p2 = pnand %p1811_p0, %p1810_p12  ;;  %p1818_p3 = scmp.lt.u32.totalorder %s1809_s12, %s2083_s8 }
  0x4c   : > { %p1817_p10 = por %p1816_p6, %p1815_p13 }
  0x4d   : > { %p1813_p1 = pneg %p1812_p2 }
  0x4e   : > { %p1819_p7 = por %p1818_p3, %p1817_p10 }
  0x50   : > { %p1820_p9 = pnand %p1819_p7, %p1813_p1 }
  0x52   : > { %1823 = shalt.err (!%p1820_p9)
}
  0x53   : > { %s1824_s30 = scalar_lea.vmem %s2085_s10, 128  ;;  %s1915_s15 = smov [#allocation2]  }
  0x54   : > { %p1825_p12 = scmp.ne.s32.totalorder %s2085_s10, %s1824_s30  ;;  %s1829_s16 = sshll.u32 %s1915_s15, 4  ;;  %s1830_s16 = int_to_ptr.vmem [resolvable:$false] %s1829_s16 }
  0x55   : > { %s1831_s9 = scalar_lea.vmem %s1830_s16, 256  ;;  %p1832_p4 = scmp.lt.s32.totalorder %s2085_s10, %s1830_s16 }
  0x56   : > { %p1827_p2 = pnand %p1825_p12, %p1811_p0  ;;  %p1833_p13 = scmp.lt.s32.totalorder %s1831_s9, %s1824_s30 }
  0x58   : > { %p1828_p5 = pneg %p1827_p2  ;;  %p1834_p6 = por %p1833_p13, %p1832_p4 }
  0x5a   : > { %p1835_p10 = pnand %p1834_p6, %p1828_p5 }
  0x5c   : > { %1838 = shalt.err (!%p1835_p10)
}
  0x5d   : > { %1701 = dma.hbm_to_vmem [thread:$0]  (!%p2087_p11), %s2083_s8, 128, %s2085_s10, %s209_s28  }
  0x5e   : > { %228 = sbr.rel (%p1990_p8) target bundleno = 665 (0x299), region = 40  ;;  %s2119_s12 = sand.u32 (!%p1990_p8), 1, %s1901_s19  }
  0x5f   : > { %s1383_s13 = sshll.u32 (!%p1990_p8), %s2119_s12, 3  ;;  %s231_s29 = scalar_lea.sflag (!%p1990_p8), [#allocation3], %s2119_s12 }
  0x60   : > { %s234_s17 = scalar_lea.vmem (!%p1990_p8), [#allocation2], %s1383_s13  ;;  %p2261_p4 = scmp.ne.s32.totalorder (!%p1990_p8), %s2254_s24, 0 }
  0x65   : > { %1884 = dma.done.wait (%p2261_p4), %s231_s29, 128  }
  0x66   : > { %1886 = vsyncadd (%p2261_p4), %s231_s29, 4294967168  ;;  %p2262_p5 = scmp.eq.s32.totalorder %s1971_s22, 0 }
  0x68   : > { %1888 = dma.done.wait (%p2262_p5), [#allocation6], 1024   ;;  %p2263_p8 = pmov %p2262_p5 }
  0x69   : > { %v1916_v0 = vmov 0.0|0.0   ;;  %vm1917_vm0 = vmmov 0   ;;  %v1918_v1 = vmov 0.0   ;;  %vm281_vm1 = vcmask 261120   ;;  %v270_v2 = vld [vmem:[#allocation5] sm:$0xff]  ;;  %v271_v3 = vld [vmem:[#allocation5 + $0x8] sm:$0xff] }
  0x6a   : > { %1890 = vsyncadd (%p2263_p8), [#allocation6], 4294966272  ;;  %1585 = vmatprep.subr.bf16.mxu0 %v1916_v0  ;;  %1461 = vmatprep.mubr.msk.f32.mxu0 %vm1917_vm0, %v1918_v1  ;;  %v272_v4 = vld [vmem:[#allocation5 + $0x10] sm:$0xff]  ;;  %v286_v5 = vand.u32 4294901760, %v270_v2  ;;  %v289_v6 = vand.u32 4294901760, %v271_v3  ;;  %v273_v7 = vld [vmem:[#allocation5 + $0x18] sm:$0xff] }
  0x6b   : > { %1621 = vmatprep.subr.bf16.mxu1 %v1916_v0  ;;  %1527 = vmatprep.mubr.msk.f32.mxu1 %vm1917_vm0, %v1918_v1  ;;  %v292_v8 = vand.u32 4294901760, %v272_v4  ;;  %v269_v9 = vld [vmem:[%s234_s17] sm:$0xff]  ;;  %v295_v10 = vand.u32 4294901760, %v273_v7  ;;  %v771_v41 = vld [vmem:[#allocation7] sm:$0xff]  ;;  %v772_v42 = vld [vmem:[#allocation7 + $0x8] sm:$0xff]  ;;  %s1390_s11 = sshll.u32 %s1971_s22, 7 }
  0x6c   : > { %v283_v11 = vsel %vm281_vm1, %v269_v9, 0  ;;  %v1586_v12 = vpack.c.bf16 %v289_v6, %v286_v5  ;;  %v366_v13 = vsub.f32 %v270_v2, %v286_v5  ;;  %v373_v14 = vsub.f32 %v271_v3, %v289_v6  ;;  %v773_v43 = vld [vmem:[#allocation7 + $0x10] sm:$0xff]  ;;  %v774_v46 = vld [vmem:[#allocation7 + $0x18] sm:$0xff]  ;;  %s268_s28 = scalar_lea.vmem [#allocation8], %s1383_s13  ;;  %s2200_s15 = scalar_lea.hbm %s2250_s5, %s1390_s11 }
  0x6d   : > { %v380_v15 = vsub.f32 %v272_v4, %v292_v8  ;;  %v387_v16 = vsub.f32 %v273_v7, %v295_v10  ;;  %v354_v17 = vand.u32 4294901760, %v283_v11  ;;  %v1589_v18 = vpack.c.bf16 %v295_v10, %v292_v8  ;;  %s1286_s7 = sshll.u32 %s268_s28, 4  ;;  %s1273_s16 = scalar_lea.sflag [#allocation4], %s2119_s12  ;;  %s2202_s7 = int_to_ptr.vmem [resolvable:$true] %s1286_s7 }
  0x6e   : > { %1587 = vmatpush3.bf16.msra.mxu0 %v1586_v12  ;;  %v367_v19 = vand.u32 4294901760, %v366_v13  ;;  %v374_v20 = vand.u32 4294901760, %v373_v14  ;;  %v1598_v37 = vpack.c.bf16 %v373_v14, %v366_v13  ;;  %v786_v44 = vand.u32 4294901760, %v771_v41  ;;  %s1839_s22 = scalar_lea.vmem %s2202_s7, 128  ;;  %p2264_p0 = scmp.ne.s32.totalorder %s2259_s23, 0 }
  0x6f   : > { %v381_v21 = vand.u32 4294901760, %v380_v15  ;;  %1588 = vmatprep.subr.bf16.mxu0 %v1916_v0  ;;  %v355_v22 = vsub.f32 %v283_v11, %v354_v17  ;;  %v388_v23 = vand.u32 4294901760, %v387_v16  ;;  %v1601_v38 = vpack.c.bf16 %v387_v16, %v380_v15  ;;  %v1387_v11 = vld [vmem:[%s2247_s2] ss:$0 sm:$0xff]  ;;  %p1840_p11 = scmp.ne.s32.totalorder %s2202_s7, %s1839_s22  ;;  %s1919_s9 = smov [#allocation8]  }
  0x70   : > { %v368_v24 = vsub.f32 %v366_v13, %v367_v19  ;;  %v375_v25 = vsub.f32 %v373_v14, %v374_v20  ;;  %v1610_v39 = vpack.c.bf16 %v374_v20, %v367_v19  ;;  %v789_v45 = vand.u32 4294901760, %v772_v42  ;;  %s1843_s13 = sshll.u32 %s1919_s9, 4  ;;  %s1844_s13 = int_to_ptr.vmem [resolvable:$false] %s1843_s13 }
  0x71   : > { %v382_v26 = vsub.f32 %v380_v15, %v381_v21  ;;  %v356_v27 = vand.u32 4294901760, %v355_v22  ;;  %v389_v28 = vsub.f32 %v387_v16, %v388_v23  ;;  %v1613_v40 = vpack.c.bf16 %v388_v23, %v381_v21  ;;  %p1841_p1 = pnand %p1840_p11, %p2264_p0  ;;  %s1845_s29 = scalar_lea.vmem %s1844_s13, 256 }
  0x72   : > { %1590 = vmatpush3.bf16.msra.mxu0 %v1589_v18  ;;  %v369_v29 = vand.u32 4294901760, %v368_v24  ;;  %v376_v30 = vand.u32 4294901760, %v375_v25  ;;  %v792_v47 = vand.u32 4294901760, %v773_v43  ;;  %v795_v48 = vand.u32 4294901760, %v774_v46  ;;  %p1846_p7 = scmp.lt.s32.totalorder %s2202_s7, %s1844_s13  ;;  %p1847_p9 = scmp.lt.s32.totalorder %s1845_s29, %s1839_s22 }
  0x73   : > { %v357_v31 = vsub.f32 %v355_v22, %v356_v27  ;;  %1591 = vmatprep.subr.bf16.mxu0 %v1916_v0  ;;  %v383_v33 = vand.u32 4294901760, %v382_v26  ;;  %v390_v34 = vand.u32 4294901760, %v389_v28  ;;  %v2161_v49 = vpack.c.bf16 %v789_v45, %v786_v44  ;;  %p1842_p3 = pneg %p1841_p1 }
  0x74   : > { %v1592_v32 = vpack.c.bf16 %v376_v30, %v369_v29  ;;  %v866_v50 = vsub.f32 %v771_v41, %v786_v44  ;;  %v873_v51 = vsub.f32 %v772_v42, %v789_v45  ;;  %v880_v52 = vsub.f32 %v773_v43, %v792_v47  ;;  %p1848_p12 = por %p1847_p9, %p1846_p7 }
  0x75   : > { %v358_v35 = vand.u32 4294901760, %v357_v31  ;;  %v1595_v36 = vpack.c.bf16 %v390_v34, %v383_v33  ;;  %v887_v53 = vsub.f32 %v774_v46, %v795_v48  ;;  %1623 = vmatpush3.bf16.msra.mxu1 %v2161_v49  ;;  %v1625_v54 = vpack.c.bf16 %v795_v48, %v792_v47 }
  0x76   : > { %1624 = vmatprep.subr.bf16.mxu1 %v1916_v0  ;;  %v867_v55 = vand.u32 4294901760, %v866_v50  ;;  %v874_v56 = vand.u32 4294901760, %v873_v51  ;;  %v881_v61 = vand.u32 4294901760, %v880_v52  ;;  %v1634_v7 = vpack.c.bf16 %v873_v51, %v866_v50  ;;  %p1849_p2 = pnand %p1848_p12, %p1842_p3 }
  0x77   : > { %1462 = vmatmul.mubr.f32.vlgmr.msra.gmra.mrb[0].mxu0 %v358_v35  ;;  %v888_v62 = vand.u32 4294901760, %v887_v53  ;;  %v1637_v8 = vpack.c.bf16 %v887_v53, %v880_v52 }
  0x78   : > { %1593 = vmatpush3.bf16.msra.mxu0 %v1592_v32  ;;  %1472 = vmatprep.mubr.msk.f32.mxu0 %vm1917_vm0, %v1918_v1  ;;  %v868_v57 = vsub.f32 %v866_v50, %v867_v55  ;;  %v875_v58 = vsub.f32 %v873_v51, %v874_v56  ;;  %v882_v2 = vsub.f32 %v880_v52, %v881_v61 }
  0x79   : > { %1594 = vmatprep.subr.bf16.mxu0 %v1916_v0  ;;  %1626 = vmatpush3.bf16.msra.mxu1 %v1625_v54  ;;  %v889_v3 = vsub.f32 %v887_v53, %v888_v62  ;;  %v1646_v9 = vpack.c.bf16 %v874_v56, %v867_v55  ;;  %v1649_v10 = vpack.c.bf16 %v888_v62, %v881_v61 }
  0x7a   : > { %1627 = vmatprep.subr.bf16.mxu1 %v1916_v0  ;;  %v869_v59 = vand.u32 4294901760, %v868_v57  ;;  %v876_v60 = vand.u32 4294901760, %v875_v58  ;;  %v883_v4 = vand.u32 4294901760, %v882_v2 }
  0x7b   : > { %v890_v5 = vand.u32 4294901760, %v889_v3 }
  0x7c   : > { %1596 = vmatpush3.bf16.msra.mxu0 %v1595_v36  ;;  %v1628_v63 = vpack.c.bf16 %v876_v60, %v869_v59 }
  0x7d   : > { %1597 = vmatprep.subr.bf16.mxu0 %v1916_v0  ;;  %v1631_v6 = vpack.c.bf16 %v890_v5, %v883_v4 }
  0x7f   : > { %1473 = vmatmul.mubr.f32.vlgmr.msra.gmra.mrb[0].mxu0 %v354_v17 }
  0x80   : > { %1599 = vmatpush3.bf16.msra.mxu0 %v1598_v37  ;;  %1483 = vmatprep.mubr.msk.f32.mxu0 %vm1917_vm0, %v1918_v1 }
  0x81   : > { %1600 = vmatprep.subr.bf16.mxu0 %v1916_v0 }
  0x84   : > { %1602 = vmatpush3.bf16.msra.mxu0 %v1601_v38 }
  0x85   : > { %1603 = vmatprep.subr.bf16.mxu0 %v1916_v0 }
  0x87   : > { %1484 = vmatmul.mubr.f32.vlgmr.msra.gmra.mrb[0].mxu0 %v355_v22  ;;  %v1388_v22 = vld [vmem:[%s2249_s4] ss:$0 sm:$0xff] }
  0x88   : > { %1605 = vmatpush3.bf16.msra.mxu0 %v1586_v12  ;;  %1494 = vmatprep.mubr.msk.f32.mxu0 %vm1917_vm0, %v1918_v1 }
  0x89   : > { %1606 = vmatprep.subr.bf16.mxu0 %v1916_v0 }
  0x8c   : > { %1608 = vmatpush3.bf16.msra.mxu0 %v1589_v18 }
  0x8d   : > { %1609 = vmatprep.subr.bf16.mxu0 %v1916_v0 }
  0x8f   : > { %1495 = vmatmul.mubr.f32.vlgmr.msra.gmra.mrb[0].mxu0 %v356_v27 }
  0x90   : > { %1611 = vmatpush3.bf16.msra.mxu0 %v1610_v39  ;;  %1505 = vmatprep.mubr.msk.f32.mxu0 %vm1917_vm0, %v1918_v1 }
  0x91   : > { %1612 = vmatprep.subr.bf16.mxu0 %v1916_v0 }
  0x94   : > { %1614 = vmatpush3.bf16.msra.mxu0 %v1613_v40 }
  0x95   : > { %1615 = vmatprep.subr.bf16.mxu0 %v1916_v0 }
  0x97   : > { %1506 = vmatmul.mubr.f32.vlgmr.msra.gmra.mrb[0].mxu0 %v354_v17 }
  0x98   : > { %1617 = vmatpush3.bf16.msra.mxu0 %v1586_v12  ;;  %1516 = vmatprep.mubr.msk.f32.mxu0 %vm1917_vm0, %v1918_v1 }
  0x99   : > { %1618 = vmatprep.subr.bf16.mxu0 %v1916_v0 }
  0x9c   : > { %1620 = vmatpush3.bf16.msra.mxu0 %v1589_v18 }
  0x9f   : > { %1517 = vmatmul.mubr.f32.vlgmr.msra.gmra.mrb[0].mxu0 %v354_v17 }
 0x172   : > { %v766_v12 = vpop.f32.mrb[0].mxu0 }
 0x173   : > { %v1657_v13 = vadd.f32 %v1387_v11, %v766_v12  ;;  %v1518_v14 = vpop.f32.mrb[1].mxu0 }
 0x175   : > { %1751 = vtanh.f32 %v1657_v13 }
 0x17f   : > { %v1752_v15 = vpop.eup %1751 }
 0x180   : > { %v783_v16 = vsel %vm281_vm1, %v1752_v15, 0 }
 0x181   : > { %v854_v17 = vand.u32 4294901760, %v783_v16 }
 0x183   : > { %v855_v18 = vsub.f32 %v783_v16, %v854_v17 }
 0x185   : > { %v856_v19 = vand.u32 4294901760, %v855_v18 }
 0x187   : > { %v857_v20 = vsub.f32 %v855_v18, %v856_v19 }
 0x189   : > { %v858_v21 = vand.u32 4294901760, %v857_v20 }
 0x18b   : > { %1528 = vmatmul.mubr.f32.vlgmr.msra.gmra.mrb[0].mxu1 %v858_v21 }
 0x18c   : > { %1629 = vmatpush3.bf16.msra.mxu1 %v1628_v63  ;;  %1538 = vmatprep.mubr.msk.f32.mxu1 %vm1917_vm0, %v1918_v1 }
 0x18d   : > { %1630 = vmatprep.subr.bf16.mxu1 %v1916_v0 }
 0x190   : > { %1632 = vmatpush3.bf16.msra.mxu1 %v1631_v6 }
 0x191   : > { %1633 = vmatprep.subr.bf16.mxu1 %v1916_v0 }
 0x193   : > { %1539 = vmatmul.mubr.f32.vlgmr.msra.gmra.mrb[0].mxu1 %v854_v17 }
 0x194   : > { %1635 = vmatpush3.bf16.msra.mxu1 %v1634_v7  ;;  %1549 = vmatprep.mubr.msk.f32.mxu1 %vm1917_vm0, %v1918_v1 }
 0x195   : > { %1636 = vmatprep.subr.bf16.mxu1 %v1916_v0 }
 0x198   : > { %1638 = vmatpush3.bf16.msra.mxu1 %v1637_v8 }
 0x199   : > { %1639 = vmatprep.subr.bf16.mxu1 %v1916_v0 }
 0x19b   : > { %1550 = vmatmul.mubr.f32.vlgmr.msra.gmra.mrb[0].mxu1 %v855_v18 }
 0x19c   : > { %1641 = vmatpush3.bf16.msra.mxu1 %v2161_v49  ;;  %1560 = vmatprep.mubr.msk.f32.mxu1 %vm1917_vm0, %v1918_v1 }
 0x19d   : > { %1642 = vmatprep.subr.bf16.mxu1 %v1916_v0 }
 0x1a0   : > { %1644 = vmatpush3.bf16.msra.mxu1 %v1625_v54 }
 0x1a1   : > { %1645 = vmatprep.subr.bf16.mxu1 %v1916_v0 }
 0x1a3   : > { %1561 = vmatmul.mubr.f32.vlgmr.msra.gmra.mrb[0].mxu1 %v856_v19 }
 0x1a4   : > { %1647 = vmatpush3.bf16.msra.mxu1 %v1646_v9  ;;  %1571 = vmatprep.mubr.msk.f32.mxu1 %vm1917_vm0, %v1918_v1 }
 0x1a5   : > { %1648 = vmatprep.subr.bf16.mxu1 %v1916_v0 }
 0x1a8   : > { %1650 = vmatpush3.bf16.msra.mxu1 %v1649_v10 }
 0x1a9   : > { %1651 = vmatprep.subr.bf16.mxu1 %v1916_v0 }
 0x1ab   : > { %1572 = vmatmul.mubr.f32.vlgmr.msra.gmra.mrb[0].mxu1 %v854_v17 }
 0x1ac   : > { %1653 = vmatpush3.bf16.msra.mxu1 %v2161_v49  ;;  %1582 = vmatprep.mubr.msk.f32.mxu1 %vm1917_vm0, %v1918_v1 }
 0x1ad   : > { %1654 = vmatprep.subr.bf16.mxu1 %v1916_v0 }
 0x1b0   : > { %1656 = vmatpush3.bf16.msra.mxu1 %v1625_v54 }
 0x1b3   : > { %1583 = vmatmul.mubr.f32.vlgmr.msra.gmra.mrb[0].mxu1 %v854_v17 }
 0x286   : > { %v1266_v23 = vpop.f32.mrb[0].mxu1 }
 0x287   : > { %v1658_v24 = vadd.f32 %v1388_v22, %v1266_v23  ;;  %v1584_v25 = vpop.f32.mrb[1].mxu1 }
 0x289   : > { %v1270_v26 = vmax.f32 %v1658_v24, 0.0 }
 0x28b   : > { %1271 = vst.msk [vmem:[%s268_s28] sm:$0xff] %vm281_vm1, %v1270_v26 }
 0x28c   : > { %1852 = shalt.err (!%p1849_p2)
}
 0x28d   : > { %s1853_s12 = scalar_lea.hbm %s2200_s15, 128  ;;  %s1857_s26 = scalar_lea.hbm %s2250_s5, 256 }
 0x28e   : > { %p1854_p13 = scmp.ne.s32.totalorder %s2200_s15, %s1853_s12  ;;  %p1858_p4 = scmp.lt.u32.totalorder %s2200_s15, %s2250_s5 }
 0x28f   : > { %p1859_p5 = scmp.lt.u32.totalorder %s1857_s26, %s1853_s12  ;;  %p1861_p11 = scmp.lt.u32.totalorder %s1853_s12, %s2200_s15 }
 0x290   : > { %p1855_p6 = pnand %p1854_p13, %p2264_p0 }
 0x291   : > { %p1860_p8 = por %p1859_p5, %p1858_p4 }
 0x292   : > { %p1856_p10 = pneg %p1855_p6 }
 0x293   : > { %p1862_p1 = por %p1861_p11, %p1860_p8 }
 0x295   : > { %p1863_p3 = pnand %p1862_p1, %p1856_p10 }
 0x297   : > { %1866 = shalt.err (!%p1863_p3)
}
 0x298   : > { %1689 = dma.vmem_to_hbm [thread:$0]  (%p2264_p0), %s2202_s7, 128, %s2200_s15, %s1273_s16  }
 0x299 PF: > { %s1298_s11 = sand.u32 1, %s1897_s18   ;;  %p2265_p7 = scmp.ne.s32.totalorder %s2255_s25, 0 }
 0x29a   : > { %p2266_p9 = scmp.ge.s32.totalorder %s1909_s21, 2  ;;  %s1299_s28 = scalar_lea.sflag [#allocation4], %s1298_s11 }
 0x29c   : > { %p1703_p12 = pnand %p2266_p9, %p2265_p7 }
 0x29e   : > { %1892 = dma.done.wait (!%p1703_p12), %s1299_s28, 128  }
 0x29f   : > { %1894 = vsyncadd (!%p1703_p12), %s1299_s28, 4294967168  ;;  %p19_p2 = scmp.ge.s32.totalorder %s2060_s14, 4   ;;  %s2267_s18 = smov %s1901_s19 }
 0x2a0   : > { %s2268_s19 = smov %s1905_s20  ;;  %s2269_s20 = smov %s2076_s27 }
 0x2a1   : > { %s2270_s21 = smov %s2060_s14  ;;  %21 = sbr.rel (!%p19_p2) target bundleno = 6 (0x6), region = 93 }
 0x2a8   :  { %1304 = vsyncpa [#allocation3], 1 }
 0x2a9   :  { %1306 = vsyncpa [#allocation3 + $0x1], 1 }
 0x2aa   :  { %1307 = vsyncpa [#allocation6], 1 }
 0x2ab   :  { %1308 = vsyncpa [#allocation4], 1 }
 0x2ac   :  { %1310 = vsyncpa [#allocation4 + $0x1], 1 }

</bundles_post_ra>
